<compile_context>
chip_gen: v6e
topology: v6e:2x2x1
jax: 0.10.0
libtpu: 0.0.40
codegen_flags: <defaults>
</compile_context>

<pallas_src>
import functools

import jax
import jax.numpy as jnp
import numpy as np
from jax import lax
from jax.experimental import pallas as pl
from jax.experimental.pallas import tpu as pltpu


# ---------------------------------------------------------------------------
# Fused kernel: projections + multi-head online-softmax attention + out proj
# ---------------------------------------------------------------------------
def _fused_kernel(q_ref, v_ref, wq_ref, wkv_ref, wp_ref, o_ref,
                  qp_scr, m_scr, l_scr, acc_scr, op_scr, *,
                  num_heads, head_pad, compute_dtype):
    j = pl.program_id(2)                  # KV-tile index (innermost, arbitrary)
    nkv = pl.num_programs(2)

    # --- first KV step for this (batch, q-tile): init online-softmax state and
    #     project the resident q tile once (q block is constant across j). ---
    @pl.when(j == 0)
    def _init():
        m_scr[...] = jnp.full_like(m_scr, -jnp.inf)
        l_scr[...] = jnp.zeros_like(l_scr)
        acc_scr[...] = jnp.zeros_like(acc_scr)
        xq = q_ref[0]                                       # [TQ, dim*3]

        def project_q(h, carry):
            # softmax scale is folded into wq host-side
            qp_scr[h] = jnp.dot(xq, wq_ref[h],
                                preferred_element_type=jnp.float32
                                ).astype(qp_scr.dtype)      # [TQ, HP]
            return carry
        lax.fori_loop(0, num_heads, project_q, 0)

    # --- per-head online-softmax update for this KV tile. ---
    xv = v_ref[0]                                           # [TK, dim*3]

    def attend_head(h, carry):
        # fused K/V projection: one GEMM per head yields both K and V
        kvh = jnp.dot(xv, wkv_ref[h],
                      preferred_element_type=jnp.float32)   # [TK, 2*HP] f32
        kh = kvh[:, :head_pad].astype(compute_dtype)        # [TK, HP]
        vh = kvh[:, head_pad:].astype(compute_dtype)        # [TK, HP]
        qh = qp_scr[h]                                      # [TQ, HP]
        # contract the (padded-to-128) feature dim of both operands (no k.T)
        s = lax.dot_general(qh, kh, (((1,), (1,)), ((), ())),
                            preferred_element_type=jnp.float32)  # [TQ, TK]
        m_prev = m_scr[h]                                   # [TQ, 1] f32
        m_new = jnp.maximum(m_prev, jnp.max(s, axis=-1, keepdims=True))
        alpha = jnp.exp(m_prev - m_new)                     # f32 softmax stats
        p = jnp.exp(s - m_new)
        l_scr[h] = alpha * l_scr[h] + jnp.sum(p, axis=-1, keepdims=True)
        acc_scr[h] = alpha * acc_scr[h] + jnp.dot(
            p.astype(compute_dtype), vh, preferred_element_type=jnp.float32)
        m_scr[h] = m_new
        return carry
    lax.fori_loop(0, num_heads, attend_head, 0)

    # --- last KV step: normalize and fold in the output projection head by
    #     head into a lane-dense f32 accumulator; one lane-dense store. ---
    @pl.when(j == nkv - 1)
    def _epilogue():
        op_scr[...] = jnp.zeros_like(op_scr)

        def project_out(h, carry):
            oh = acc_scr[h] * pl.reciprocal(l_scr[h], approx=True)   # [TQ, HP]
            op_scr[...] += jnp.dot(oh.astype(compute_dtype), wp_ref[h],
                                   preferred_element_type=jnp.float32)
            return carry
        lax.fori_loop(0, num_heads, project_out, 0)
        o_ref[0] = op_scr[...].astype(o_ref.dtype)


# ---------------------------------------------------------------------------
# Host-side weight expansion (zero-padded, 128-lane-aligned head slabs)
# ---------------------------------------------------------------------------
def _round_up(x, m):
    return (x + m - 1) // m * m


def _pick_tile(n, target):
    """Largest multiple-of-8 divisor of n that is <= target (else n itself)."""
    if n <= target:
        return n
    t = (target // 8) * 8
    while t >= 8:
        if n % t == 0:
            return t
        t -= 8
    return n


def _expand_head_weight(w, num_heads, head_pad):
    """VecLinear ('so3') weight [out, in] -> per-head dense weight
    [num_heads, in*3, head_pad] for the lane-dense [N, in*3] activation layout.
    Head h's first dp*3 columns realise kron(w_head_h, I3).T; padding is zero."""
    out_dim, in_dim = w.shape
    dp = out_dim // num_heads
    w_e = jnp.kron(w, jnp.eye(3, dtype=w.dtype)).T              # [in*3, out*3]
    w_e = w_e.reshape(in_dim * 3, num_heads, dp * 3).transpose(1, 0, 2)
    return jnp.pad(w_e, ((0, 0), (0, 0), (0, head_pad - dp * 3)))


def _expand_proj_weight(w, num_heads, head_pad, out_pad):
    """proj VecLinear weight [out, in] -> per-head slab
    [num_heads, head_pad, out_pad]: rows of kron(w, I3).T grouped by the head
    that produced them; padded rows/cols are exactly zero."""
    out_dim, in_dim = w.shape
    dp = in_dim // num_heads
    w_e = jnp.kron(w, jnp.eye(3, dtype=w.dtype)).T              # [in*3, out*3]
    w_e = w_e.reshape(num_heads, dp * 3, out_dim * 3)
    return jnp.pad(w_e, ((0, 0), (0, head_pad - dp * 3),
                         (0, out_pad - out_dim * 3)))


# ---------------------------------------------------------------------------
# Wrapper
# ---------------------------------------------------------------------------
def vn_cross_attention(q, v, params, num_heads, *,
                       compute_dtype=jnp.bfloat16,
                       # per-generation suggestions:
                       #   v7x: tq 256, tk 512,   vmem ~48 MiB (64 MiB VMEM)
                       #   v6e: tq 512, tk 1024+, vmem 64-100 MiB
                       #   v5e: tk ~1024, vmem > 16 MiB scoped default
                       tq_target=256, tk_target=512,
                       vmem_limit_bytes=48 << 20):
    # q: [B, Nq, dim, 3], v: [B, Nv, dim, 3] -> [B, Nq, out_dim, 3]
    B, Nq, dim, _ = q.shape
    Nv = v.shape[1]
    out_dim = params["wq"].shape[0]
    assert out_dim % num_heads == 0
    dp = out_dim // num_heads
    E = dp * 3                                  # true per-head feature width
    HP = _round_up(E, 128)                      # 128-lane-aligned head slot
    OUTP = _round_up(out_dim * 3, 128)          # lane-dense output width
    scale = float(E) ** -0.5

    # Lane-dense activations: column = channel*3 + xyz (pure reshape); cast to
    # the MXU feed dtype host-side (halves input DMA bytes).
    q2 = q.reshape(B, Nq, dim * 3).astype(compute_dtype)
    v2 = v.reshape(B, Nv, dim * 3).astype(compute_dtype)

    # Head-blocked, 128-padded, host-cast weights. Softmax scale folded into
    # wq (zero in-kernel cost); k_map and v_map fused so one GEMM per head
    # produces both K and V.
    wq_e = (_expand_head_weight(params["wq"], num_heads, HP) * scale
            ).astype(compute_dtype)
    wkv_e = jnp.concatenate(
        [_expand_head_weight(params["wk"], num_heads, HP),
         _expand_head_weight(params["wv"], num_heads, HP)],
        axis=-1).astype(compute_dtype)                       # [NH, dim*3, 2*HP]
    wp_e = _expand_proj_weight(params["wp"], num_heads, HP, OUTP
                               ).astype(compute_dtype)       # [NH, HP, OUTP]

    TQ = _pick_tile(Nq, tq_target)
    TK = _pick_tile(Nv, tk_target)
    grid = (B, Nq // TQ, Nv // TK)

    kernel = functools.partial(_fused_kernel, num_heads=num_heads,
                               head_pad=HP, compute_dtype=compute_dtype)

    out = pl.pallas_call(
        kernel,
        out_shape=jax.ShapeDtypeStruct((B, Nq, OUTP), jnp.float32),
        grid=grid,
        in_specs=[
            pl.BlockSpec((1, TQ, dim * 3), lambda b, i, j: (b, i, 0)),
            pl.BlockSpec((1, TK, dim * 3), lambda b, i, j: (b, j, 0)),
            pl.BlockSpec((num_heads, dim * 3, HP), lambda b, i, j: (0, 0, 0)),
            pl.BlockSpec((num_heads, dim * 3, 2 * HP), lambda b, i, j: (0, 0, 0)),
            pl.BlockSpec((num_heads, HP, OUTP), lambda b, i, j: (0, 0, 0)),
        ],
        out_specs=pl.BlockSpec((1, TQ, OUTP), lambda b, i, j: (b, i, 0)),
        scratch_shapes=[
            pltpu.VMEM((num_heads, TQ, HP), compute_dtype),   # resident q proj
            pltpu.VMEM((num_heads, TQ, 1), jnp.float32),      # m (online softmax)
            pltpu.VMEM((num_heads, TQ, 1), jnp.float32),      # l
            pltpu.VMEM((num_heads, TQ, HP), jnp.float32),     # acc
            pltpu.VMEM((TQ, OUTP), jnp.float32),              # out-proj accumulator
        ],
        compiler_params=pltpu.CompilerParams(
            dimension_semantics=("parallel", "parallel", "arbitrary"),
            vmem_limit_bytes=vmem_limit_bytes),
    )(q2, v2, wq_e, wkv_e, wp_e)

    # strip lane padding; column o*3+c -> [.., out_dim, 3] (pure reshape,
    # matches torch's final permute)
    return out[:, :, :out_dim * 3].reshape(B, Nq, out_dim, 3)


# ---------------------------------------------------------------------------
# Pure-JAX reference (self-check)
# ---------------------------------------------------------------------------
def _reference(q, v, params, num_heads):
    def vl(x, w):
        return jnp.einsum('bnic,oi->bnoc', x, w)

    B, Nq = q.shape[0], q.shape[1]
    Nv = v.shape[1]
    out_dim = params["wq"].shape[0]
    dp = out_dim // num_heads

    qf, kf, vf = vl(q, params["wq"]), vl(v, params["wk"]), vl(v, params["wv"])

    def heads(t, n):
        return (t.reshape(B, n, num_heads, dp, 3)
                 .transpose(0, 2, 1, 3, 4)
                 .reshape(B, num_heads, n, dp * 3))

    qh, kh, vh = heads(qf, Nq), heads(kf, Nv), heads(vf, Nv)
    scale = float(dp * 3) ** -0.5
    s = jnp.einsum('bhqe,bhke->bhqk', qh, kh) * scale
    p = jax.nn.softmax(s, axis=-1)
    xh = jnp.einsum('bhqk,bhke->bhqe', p, vh)
    x = (xh.reshape(B, num_heads, Nq, dp, 3)
           .transpose(0, 2, 1, 3, 4)
           .reshape(B, Nq, out_dim, 3))
    return vl(x, params["wp"])


# ---------------------------------------------------------------------------
if __name__ == "__main__":
    B, Nq, Nv = 2, 16, 16
    dim, out_dim, num_heads = 8, 16, 8      # dp = 2, per-head feature width E = 6

    key = jax.random.PRNGKey(0)
    kq, kv, k1, k2, k3, k4 = jax.random.split(key, 6)

    q = jax.random.normal(kq, (B, Nq, dim, 3), jnp.float32)
    v = jax.random.normal(kv, (B, Nv, dim, 3), jnp.float32)

    def init_w(k, o, i):
        bound = 1.0 / np.sqrt(i)            # nn.Linear-style deterministic init
        return jax.random.uniform(k, (o, i), jnp.float32, -bound, bound)

    params = dict(
        wq=init_w(k1, out_dim, dim),
        wk=init_w(k2, out_dim, dim),
        wv=init_w(k3, out_dim, dim),
        wp=init_w(k4, out_dim, out_dim),
    )

    ref = _reference(q, v, params, num_heads)

    # 1) Default path: bf16 MXU feeds, single q / kv tile per batch element.
    fwd = jax.jit(functools.partial(vn_cross_attention, num_heads=num_heads))
    out = jax.block_until_ready(fwd(q, v, params))
    assert out.shape == (B, Nq, out_dim, 3)
    np.testing.assert_allclose(np.asarray(out), np.asarray(ref),
                               rtol=3e-2, atol=3e-2)

    # 2) f32 path with forced 8x8 tiles: exercises the multi-step online-softmax
    #    KV axis and the multi-tile Nq axis of the flash-style grid.
    fwd_tiled = jax.jit(functools.partial(
        vn_cross_attention, num_heads=num_heads, compute_dtype=jnp.float32,
        tq_target=8, tk_target=8))
    out_tiled = jax.block_until_ready(fwd_tiled(q, v, params))
    np.testing.assert_allclose(np.asarray(out_tiled), np.asarray(ref),
                               rtol=2e-3, atol=2e-3)

    print("KERNEL_OK")
</pallas_src>

<mosaic_0001>
module attributes {stable_mosaic.version = 11 : i64} {
  func.func @_fused_kernel(%arg0: i32, %arg1: i32, %arg2: i32, %arg3: memref<1x16x24xbf16, #tpu.memory_space<vmem>>, %arg4: memref<1x16x24xbf16, #tpu.memory_space<vmem>>, %arg5: memref<8x24x128xbf16, #tpu.memory_space<vmem>>, %arg6: memref<8x24x256xbf16, #tpu.memory_space<vmem>>, %arg7: memref<8x128x128xbf16, #tpu.memory_space<vmem>>, %arg8: memref<1x16x128xf32, #tpu.memory_space<vmem>>, %arg9: memref<8x16x128xbf16, #tpu.memory_space<vmem>>, %arg10: memref<8x16x1xf32, #tpu.memory_space<vmem>>, %arg11: memref<8x16x1xf32, #tpu.memory_space<vmem>>, %arg12: memref<8x16x128xf32, #tpu.memory_space<vmem>>, %arg13: memref<16x128xf32, #tpu.memory_space<vmem>>) attributes {dimension_semantics = [#tpu.dimension_semantics<parallel>, #tpu.dimension_semantics<parallel>, #tpu.dimension_semantics<arbitrary>], iteration_bounds = array<i64: 2, 1, 1>, scalar_prefetch = 0 : i64, scratch_operands = 5 : i64, tpu.core_type = #tpu.core_type<tc>, window_params = [{transform_indices = @transform_0, window_bounds = array<i64: 1, 16, 24>}, {transform_indices = @transform_1, window_bounds = array<i64: 1, 16, 24>}, {pipeline_mode = #tpu.pipeline_mode<synchronous>, transform_indices = @transform_2, window_bounds = array<i64: 8, 24, 128>}, {pipeline_mode = #tpu.pipeline_mode<synchronous>, transform_indices = @transform_3, window_bounds = array<i64: 8, 24, 256>}, {pipeline_mode = #tpu.pipeline_mode<synchronous>, transform_indices = @transform_4, window_bounds = array<i64: 8, 128, 128>}, {transform_indices = @transform_5, window_bounds = array<i64: 1, 16, 128>}]} {
    %c0_i32 = arith.constant 0 : i32
    %0 = arith.cmpi eq, %arg2, %c0_i32 : i32
    %1 = arith.extui %0 : i1 to i32
    %c0_i32_0 = arith.constant 0 : i32
    %2 = arith.cmpi ne, %1, %c0_i32_0 : i32
    scf.if %2 {
      %cst = arith.constant 0xFF800000 : f32
      %9 = vector.broadcast %cst : f32 to vector<8x16x1xf32>
      %c0_7 = arith.constant 0 : index
      %c0_8 = arith.constant 0 : index
      %c0_9 = arith.constant 0 : index
      %10 = vector.load %arg10[%c0_7, %c0_8, %c0_9] : memref<8x16x1xf32, #tpu.memory_space<vmem>>, vector<8x16x1xf32>
      tpu.vector_store %arg10[%c0_7, %c0_8, %c0_9], %9 {strides = array<i32>} : memref<8x16x1xf32, #tpu.memory_space<vmem>>, vector<8x16x1xf32>,
      %cst_10 = arith.constant 0.000000e+00 : f32
      %11 = vector.broadcast %cst_10 : f32 to vector<8x16x1xf32>
      %c0_11 = arith.constant 0 : index
      %c0_12 = arith.constant 0 : index
      %c0_13 = arith.constant 0 : index
      %12 = vector.load %arg11[%c0_11, %c0_12, %c0_13] : memref<8x16x1xf32, #tpu.memory_space<vmem>>, vector<8x16x1xf32>
      tpu.vector_store %arg11[%c0_11, %c0_12, %c0_13], %11 {strides = array<i32>} : memref<8x16x1xf32, #tpu.memory_space<vmem>>, vector<8x16x1xf32>,
      %cst_14 = arith.constant 0.000000e+00 : f32
      %13 = vector.broadcast %cst_14 : f32 to vector<8x16x128xf32>
      %c0_15 = arith.constant 0 : index
      %c0_16 = arith.constant 0 : index
      %c0_17 = arith.constant 0 : index
      %14 = vector.load %arg12[%c0_15, %c0_16, %c0_17] : memref<8x16x128xf32, #tpu.memory_space<vmem>>, vector<8x16x128xf32>
      tpu.vector_store %arg12[%c0_15, %c0_16, %c0_17], %13 {strides = array<i32>} : memref<8x16x128xf32, #tpu.memory_space<vmem>>, vector<8x16x128xf32>,
      %c0_18 = arith.constant 0 : index
      %c0_19 = arith.constant 0 : index
      %c0_20 = arith.constant 0 : index
      %15 = vector.load %arg3[%c0_18, %c0_19, %c0_20] : memref<1x16x24xbf16, #tpu.memory_space<vmem>>, vector<1x16x24xbf16>
      %16 = vector.shape_cast %15 : vector<1x16x24xbf16> to vector<16x24xbf16>
      %c0_i32_21 = arith.constant 0 : i32
      %c8_i32_22 = arith.constant 8 : i32
      %17 = arith.addi %c0_i32_21, %c8_i32_22 : i32
      %c1_i32_23 = arith.constant 1 : i32
      scf.for %arg14 = %c0_i32_21 to %17 step %c1_i32_23  : i32 {
        %18 = arith.index_cast %arg14 : i32 to index
        %c0_25 = arith.constant 0 : index
        %c0_26 = arith.constant 0 : index
        %19 = vector.load %arg5[%18, %c0_25, %c0_26] : memref<8x24x128xbf16, #tpu.memory_space<vmem>>, vector<1x24x128xbf16>
        %20 = vector.shape_cast %19 : vector<1x24x128xbf16> to vector<24x128xbf16>
        %cst_27 = arith.constant dense<0.000000e+00> : vector<16x128xf32>
        %21 = tpu.matmul %16, %20, %cst_27 {dimension_numbers = #tpu.dot_dimension_numbers<[1], [0], [0], [1], [0, 0, 1, 1], [], []>} : vector<16x24xbf16>, vector<24x128xbf16>, vector<16x128xf32> -> vector<16x128xf32>
        %22 = arith.truncf %21 : vector<16x128xf32> to vector<16x128xbf16>
        %23 = arith.index_cast %arg14 : i32 to index
        %c0_28 = arith.constant 0 : index
        %c0_29 = arith.constant 0 : index
        %24 = vector.load %arg9[%23, %c0_28, %c0_29] : memref<8x16x128xbf16, #tpu.memory_space<vmem>>, vector<1x16x128xbf16>
        %25 = vector.shape_cast %24 : vector<1x16x128xbf16> to vector<16x128xbf16>
        %26 = vector.shape_cast %22 : vector<16x128xbf16> to vector<1x16x128xbf16>
        tpu.vector_store %arg9[%23, %c0_28, %c0_29], %26 {strides = array<i32>} : memref<8x16x128xbf16, #tpu.memory_space<vmem>>, vector<1x16x128xbf16>,
      }
      %c8_i32_24 = arith.constant 8 : i32
    } else {
    }
    %c0 = arith.constant 0 : index
    %c0_1 = arith.constant 0 : index
    %c0_2 = arith.constant 0 : index
    %3 = vector.load %arg4[%c0, %c0_1, %c0_2] : memref<1x16x24xbf16, #tpu.memory_space<vmem>>, vector<1x16x24xbf16>
    %4 = vector.shape_cast %3 : vector<1x16x24xbf16> to vector<16x24xbf16>
    %c0_i32_3 = arith.constant 0 : i32
    %c8_i32 = arith.constant 8 : i32
    %5 = arith.addi %c0_i32_3, %c8_i32 : i32
    %c1_i32 = arith.constant 1 : i32
    scf.for %arg14 = %c0_i32_3 to %5 step %c1_i32  : i32 {
      %9 = arith.index_cast %arg14 : i32 to index
      %c0_7 = arith.constant 0 : index
      %c0_8 = arith.constant 0 : index
      %10 = vector.load %arg6[%9, %c0_7, %c0_8] : memref<8x24x256xbf16, #tpu.memory_space<vmem>>, vector<1x24x256xbf16>
      %11 = vector.shape_cast %10 : vector<1x24x256xbf16> to vector<24x256xbf16>
      %cst = arith.constant dense<0.000000e+00> : vector<16x256xf32>
      %12 = tpu.matmul %4, %11, %cst {dimension_numbers = #tpu.dot_dimension_numbers<[1], [0], [0], [1], [0, 0, 1, 1], [], []>} : vector<16x24xbf16>, vector<24x256xbf16>, vector<16x256xf32> -> vector<16x256xf32>
      %13 = vector.extract_strided_slice %12 {offsets = [0, 0], sizes = [16, 128], strides = [1, 1]} : vector<16x256xf32> to vector<16x128xf32>
      %14 = arith.truncf %13 : vector<16x128xf32> to vector<16x128xbf16>
      %15 = vector.extract_strided_slice %12 {offsets = [0, 128], sizes = [16, 128], strides = [1, 1]} : vector<16x256xf32> to vector<16x128xf32>
      %16 = arith.truncf %15 : vector<16x128xf32> to vector<16x128xbf16>
      %17 = arith.index_cast %arg14 : i32 to index
      %c0_9 = arith.constant 0 : index
      %c0_10 = arith.constant 0 : index
      %18 = vector.load %arg9[%17, %c0_9, %c0_10] : memref<8x16x128xbf16, #tpu.memory_space<vmem>>, vector<1x16x128xbf16>
      %19 = vector.shape_cast %18 : vector<1x16x128xbf16> to vector<16x128xbf16>
      %cst_11 = arith.constant dense<0.000000e+00> : vector<16x16xf32>
      %20 = tpu.matmul %19, %14, %cst_11 {dimension_numbers = #tpu.dot_dimension_numbers<[1], [1], [0], [0], [0, 0, 1, 0], [], []>} : vector<16x128xbf16>, vector<16x128xbf16>, vector<16x16xf32> -> vector<16x16xf32>
      %21 = arith.index_cast %arg14 : i32 to index
      %c0_12 = arith.constant 0 : index
      %c0_13 = arith.constant 0 : index
      %22 = vector.load %arg10[%21, %c0_12, %c0_13] : memref<8x16x1xf32, #tpu.memory_space<vmem>>, vector<1x16x1xf32>
      %23 = vector.shape_cast %22 : vector<1x16x1xf32> to vector<16x1xf32>
      %cst_14 = arith.constant dense<0xFF800000> : vector<16xf32>
      %24 = vector.multi_reduction <maximumf>, %20, %cst_14 [1] : vector<16x16xf32> to vector<16xf32>
      %25 = vector.shape_cast %24 : vector<16xf32> to vector<16x1xf32>
      %26 = arith.maximumf %23, %25 : vector<16x1xf32>
      %27 = arith.subf %23, %26 : vector<16x1xf32>
      %28 = math.exp %27 : vector<16x1xf32>
      %29 = vector.broadcast %26 : vector<16x1xf32> to vector<16x16xf32>
      %30 = arith.subf %20, %29 : vector<16x16xf32>
      %31 = math.exp %30 : vector<16x16xf32>
      %32 = arith.index_cast %arg14 : i32 to index
      %c0_15 = arith.constant 0 : index
      %c0_16 = arith.constant 0 : index
      %33 = vector.load %arg11[%32, %c0_15, %c0_16] : memref<8x16x1xf32, #tpu.memory_space<vmem>>, vector<1x16x1xf32>
      %34 = vector.shape_cast %33 : vector<1x16x1xf32> to vector<16x1xf32>
      %35 = arith.mulf %28, %34 : vector<16x1xf32>
      %cst_17 = arith.constant dense<0.000000e+00> : vector<16xf32>
      %36 = vector.multi_reduction <add>, %31, %cst_17 [1] : vector<16x16xf32> to vector<16xf32>
      %37 = vector.shape_cast %36 : vector<16xf32> to vector<16x1xf32>
      %38 = arith.addf %35, %37 : vector<16x1xf32>
      %39 = arith.index_cast %arg14 : i32 to index
      %c0_18 = arith.constant 0 : index
      %c0_19 = arith.constant 0 : index
      %40 = vector.load %arg11[%39, %c0_18, %c0_19] : memref<8x16x1xf32, #tpu.memory_space<vmem>>, vector<1x16x1xf32>
      %41 = vector.shape_cast %40 : vector<1x16x1xf32> to vector<16x1xf32>
      %42 = vector.shape_cast %38 : vector<16x1xf32> to vector<1x16x1xf32>
      tpu.vector_store %arg11[%39, %c0_18, %c0_19], %42 {strides = array<i32>} : memref<8x16x1xf32, #tpu.memory_space<vmem>>, vector<1x16x1xf32>,
      %43 = arith.index_cast %arg14 : i32 to index
      %c0_20 = arith.constant 0 : index
      %c0_21 = arith.constant 0 : index
      %44 = vector.load %arg12[%43, %c0_20, %c0_21] : memref<8x16x128xf32, #tpu.memory_space<vmem>>, vector<1x16x128xf32>
      %45 = vector.shape_cast %44 : vector<1x16x128xf32> to vector<16x128xf32>
      %46 = vector.broadcast %28 : vector<16x1xf32> to vector<16x128xf32>
      %47 = arith.mulf %46, %45 : vector<16x128xf32>
      %48 = arith.truncf %31 : vector<16x16xf32> to vector<16x16xbf16>
      %cst_22 = arith.constant dense<0.000000e+00> : vector<16x128xf32>
      %49 = tpu.matmul %48, %16, %cst_22 {dimension_numbers = #tpu.dot_dimension_numbers<[1], [0], [0], [1], [0, 0, 1, 1], [], []>} : vector<16x16xbf16>, vector<16x128xbf16>, vector<16x128xf32> -> vector<16x128xf32>
      %50 = arith.addf %47, %49 : vector<16x128xf32>
      %51 = arith.index_cast %arg14 : i32 to index
      %c0_23 = arith.constant 0 : index
      %c0_24 = arith.constant 0 : index
      %52 = vector.load %arg12[%51, %c0_23, %c0_24] : memref<8x16x128xf32, #tpu.memory_space<vmem>>, vector<1x16x128xf32>
      %53 = vector.shape_cast %52 : vector<1x16x128xf32> to vector<16x128xf32>
      %54 = vector.shape_cast %50 : vector<16x128xf32> to vector<1x16x128xf32>
      tpu.vector_store %arg12[%51, %c0_23, %c0_24], %54 {strides = array<i32>} : memref<8x16x128xf32, #tpu.memory_space<vmem>>, vector<1x16x128xf32>,
      %55 = arith.index_cast %arg14 : i32 to index
      %c0_25 = arith.constant 0 : index
      %c0_26 = arith.constant 0 : index
      %56 = vector.load %arg10[%55, %c0_25, %c0_26] : memref<8x16x1xf32, #tpu.memory_space<vmem>>, vector<1x16x1xf32>
      %57 = vector.shape_cast %56 : vector<1x16x1xf32> to vector<16x1xf32>
      %58 = vector.shape_cast %26 : vector<16x1xf32> to vector<1x16x1xf32>
      tpu.vector_store %arg10[%55, %c0_25, %c0_26], %58 {strides = array<i32>} : memref<8x16x1xf32, #tpu.memory_space<vmem>>, vector<1x16x1xf32>,
    }
    %c8_i32_4 = arith.constant 8 : i32
    %c0_i32_5 = arith.constant 0 : i32
    %6 = arith.cmpi eq, %arg2, %c0_i32_5 : i32
    %7 = arith.extui %6 : i1 to i32
    %c0_i32_6 = arith.constant 0 : i32
    %8 = arith.cmpi ne, %7, %c0_i32_6 : i32
    scf.if %8 {
      %cst = arith.constant 0.000000e+00 : f32
      %9 = vector.broadcast %cst : f32 to vector<16x128xf32>
      %c0_7 = arith.constant 0 : index
      %c0_8 = arith.constant 0 : index
      %10 = vector.load %arg13[%c0_7, %c0_8] : memref<16x128xf32, #tpu.memory_space<vmem>>, vector<16x128xf32>
      tpu.vector_store %arg13[%c0_7, %c0_8], %9 {strides = array<i32>} : memref<16x128xf32, #tpu.memory_space<vmem>>, vector<16x128xf32>,
      %c0_i32_9 = arith.constant 0 : i32
      %c8_i32_10 = arith.constant 8 : i32
      %11 = arith.addi %c0_i32_9, %c8_i32_10 : i32
      %c1_i32_11 = arith.constant 1 : i32
      scf.for %arg14 = %c0_i32_9 to %11 step %c1_i32_11  : i32 {
        %16 = arith.index_cast %arg14 : i32 to index
        %c0_18 = arith.constant 0 : index
        %c0_19 = arith.constant 0 : index
        %17 = vector.load %arg12[%16, %c0_18, %c0_19] : memref<8x16x128xf32, #tpu.memory_space<vmem>>, vector<1x16x128xf32>
        %18 = vector.shape_cast %17 : vector<1x16x128xf32> to vector<16x128xf32>
        %19 = arith.index_cast %arg14 : i32 to index
        %c0_20 = arith.constant 0 : index
        %c0_21 = arith.constant 0 : index
        %20 = vector.load %arg11[%19, %c0_20, %c0_21] : memref<8x16x1xf32, #tpu.memory_space<vmem>>, vector<1x16x1xf32>
        %21 = vector.shape_cast %20 : vector<1x16x1xf32> to vector<16x1xf32>
        %22 = tpu.reciprocal %21 {approx = true} : vector<16x1xf32> -> vector<16x1xf32>
        %23 = vector.broadcast %22 : vector<16x1xf32> to vector<16x128xf32>
        %24 = arith.mulf %18, %23 : vector<16x128xf32>
        %c0_22 = arith.constant 0 : index
        %c0_23 = arith.constant 0 : index
        %25 = vector.load %arg13[%c0_22, %c0_23] : memref<16x128xf32, #tpu.memory_space<vmem>>, vector<16x128xf32>
        %26 = arith.truncf %24 : vector<16x128xf32> to vector<16x128xbf16>
        %27 = arith.index_cast %arg14 : i32 to index
        %c0_24 = arith.constant 0 : index
        %c0_25 = arith.constant 0 : index
        %28 = vector.load %arg7[%27, %c0_24, %c0_25] : memref<8x128x128xbf16, #tpu.memory_space<vmem>>, vector<1x128x128xbf16>
        %29 = vector.shape_cast %28 : vector<1x128x128xbf16> to vector<128x128xbf16>
        %cst_26 = arith.constant dense<0.000000e+00> : vector<16x128xf32>
        %30 = tpu.matmul %26, %29, %cst_26 {dimension_numbers = #tpu.dot_dimension_numbers<[1], [0], [0], [1], [0, 0, 1, 1], [], []>} : vector<16x128xbf16>, vector<128x128xbf16>, vector<16x128xf32> -> vector<16x128xf32>
        %31 = arith.addf %25, %30 : vector<16x128xf32>
        %c0_27 = arith.constant 0 : index
        %c0_28 = arith.constant 0 : index
        %32 = vector.load %arg13[%c0_27, %c0_28] : memref<16x128xf32, #tpu.memory_space<vmem>>, vector<16x128xf32>
        tpu.vector_store %arg13[%c0_27, %c0_28], %31 {strides = array<i32>} : memref<16x128xf32, #tpu.memory_space<vmem>>, vector<16x128xf32>,
      }
      %c8_i32_12 = arith.constant 8 : i32
      %c0_13 = arith.constant 0 : index
      %c0_14 = arith.constant 0 : index
      %12 = vector.load %arg13[%c0_13, %c0_14] : memref<16x128xf32, #tpu.memory_space<vmem>>, vector<16x128xf32>
      %c0_15 = arith.constant 0 : index
      %c0_16 = arith.constant 0 : index
      %c0_17 = arith.constant 0 : index
      %13 = vector.load %arg8[%c0_15, %c0_16, %c0_17] : memref<1x16x128xf32, #tpu.memory_space<vmem>>, vector<1x16x128xf32>
      %14 = vector.shape_cast %13 : vector<1x16x128xf32> to vector<16x128xf32>
      %15 = vector.shape_cast %12 : vector<16x128xf32> to vector<1x16x128xf32>
      tpu.vector_store %arg8[%c0_15, %c0_16, %c0_17], %15 {strides = array<i32>} : memref<1x16x128xf32, #tpu.memory_space<vmem>>, vector<1x16x128xf32>,
    } else {
    }
    return
  }
  func.func @transform_0(%arg0: i32, %arg1: i32, %arg2: i32) -> (i32, i32, i32) {
    %c0_i32 = arith.constant 0 : i32
    %c0_i32_0 = arith.constant 0 : i32
    return %arg0, %arg1, %c0_i32 : i32, i32, i32
  }
  func.func @transform_1(%arg0: i32, %arg1: i32, %arg2: i32) -> (i32, i32, i32) {
    %c0_i32 = arith.constant 0 : i32
    %c0_i32_0 = arith.constant 0 : i32
    return %arg0, %arg2, %c0_i32 : i32, i32, i32
  }
  func.func @transform_2(%arg0: i32, %arg1: i32, %arg2: i32) -> (i32, i32, i32) {
    %c0_i32 = arith.constant 0 : i32
    %c0_i32_0 = arith.constant 0 : i32
    %c0_i32_1 = arith.constant 0 : i32
    %c0_i32_2 = arith.constant 0 : i32
    return %c0_i32, %c0_i32_0, %c0_i32_1 : i32, i32, i32
  }
  func.func @transform_3(%arg0: i32, %arg1: i32, %arg2: i32) -> (i32, i32, i32) {
    %c0_i32 = arith.constant 0 : i32
    %c0_i32_0 = arith.constant 0 : i32
    %c0_i32_1 = arith.constant 0 : i32
    %c0_i32_2 = arith.constant 0 : i32
    return %c0_i32, %c0_i32_0, %c0_i32_1 : i32, i32, i32
  }
  func.func @transform_4(%arg0: i32, %arg1: i32, %arg2: i32) -> (i32, i32, i32) {
    %c0_i32 = arith.constant 0 : i32
    %c0_i32_0 = arith.constant 0 : i32
    %c0_i32_1 = arith.constant 0 : i32
    %c0_i32_2 = arith.constant 0 : i32
    return %c0_i32, %c0_i32_0, %c0_i32_1 : i32, i32, i32
  }
  func.func @transform_5(%arg0: i32, %arg1: i32, %arg2: i32) -> (i32, i32, i32) {
    %c0_i32 = arith.constant 0 : i32
    %c0_i32_0 = arith.constant 0 : i32
    return %arg0, %arg1, %c0_i32 : i32, i32, i32
  }
}

</mosaic_0001>

<bundles_post_ra>
// kernel: vn_cross_attention.1
= control target key start
LH: loop header
LB: loop body
LE: loop exit
PB: predicated region body
PF: predicated region fallthrough
CT: control target
= control target key end

     0   :  { %s1296_s18 = smov 0   ;;  %s1298_s19 = smov 0   ;;  %s1486_s0 = inlined_call_operand.vmem [shape: bf16[2,16,24], index: 0, kind: input, shape index: {}]   ;;  %s1487_s1 = inlined_call_operand.vmem [shape: bf16[2,16,24], index: 1, kind: input, shape index: {}]   ;;  %s1488_s2 = inlined_call_operand.vmem [shape: bf16[8,24,128], index: 2, kind: input, shape index: {}]   ;;  %s1489_s3 = inlined_call_operand.vmem [shape: bf16[8,24,256], index: 3, kind: input, shape index: {}]   ;;  %s1490_s4 = inlined_call_operand.vmem [shape: bf16[8,128,128], index: 4, kind: input, shape index: {}]   ;;  %s1491_s5 = inlined_call_operand.vmem [shape: f32[2,16,128], index: 5, kind: output, shape index: {}]  }
   0x1   :  { %s1300_s20 = smov 0  }
   0x2 LB: > { %s34_s21 = sadd.s32 1, %s1238_s19  ;;  %p1007_p0 = scmp.ge.s32.totalorder %s1242_s20, 1  ;;  %s1242_s20 = sphi %s1300_s20, %s15_s20   ;;  %s1238_s19 = sphi %s1298_s19, %s1493_s19   ;;  %s1234_s18 = sphi %s1296_s18, %s1492_s18  }
   0x3   : > { %p36_p1 = scmp.ge.s32.totalorder %s34_s21, 2  ;;  %p232_p2 = scmp.lt.s32.totalorder %s1242_s20, 3 }
   0x5   : > { %s1495_s21 = smov (%p36_p1, %s34_s21), 0  ;;  %p233_p3 = pnand %p1007_p0, %p232_p2 }
   0x6   : > { %p278_p4 = scmp.lt.s32.totalorder (!%p233_p3), %s1234_s18, 1  ;;  %s1397_s8 = smov (!%p233_p3), 0  }
   0x7   : > { %236 = sbr.rel (%p233_p3) target bundleno = 1508 (0x5e4), region = 40 }
   0xc   : > { %vm312_vm0 = vcmask 7168   ;;  %v1256_v0 = vmov -inf   ;;  %v1257_v1 = vmov 0.0   ;;  %s1497_s18 = smov (!%p278_p4, %s1234_s18), 1 }
   0xd   : > { %313 = vst.msk [vmem:[#allocation3] sm:$0xff] %vm312_vm0, %v1256_v0  ;;  %314 = vst.msk [vmem:[#allocation3 + $0x8] sm:$0xff] %vm312_vm0, %v1256_v0  ;;  %s1048_s22 = sshll.u32 %s1497_s18, 3  ;;  %s1050_s23 = sshll.u32 %s1497_s18, 4 }
   0xe   : > { %315 = vst.msk [vmem:[#allocation3 + $0x10] sm:$0xff] %vm312_vm0, %v1256_v0  ;;  %316 = vst.msk [vmem:[#allocation3 + $0x18] sm:$0xff] %vm312_vm0, %v1256_v0  ;;  %s285_s26 = scalar_lea.vmem %s1486_s0, %s1048_s22  ;;  %s1390_s29 = scalar_lea.vmem %s1487_s1, %s1048_s22 }
   0xf   : > { %317 = vst.msk [vmem:[#allocation3 + $0x20] sm:$0xff] %vm312_vm0, %v1256_v0  ;;  %318 = vst.msk [vmem:[#allocation3 + $0x28] sm:$0xff] %vm312_vm0, %v1256_v0  ;;  %s1395_s7 = scalar_lea.vmem %s1491_s5, %s1050_s23  ;;  %v361_v2 = vld [vmem:[%s285_s26] sm:$0xf]  ;;  %v362_v3 = vld [vmem:[%s285_s26 + $0x4] sm:$0xf] }
  0x10   : > { %319 = vst.msk [vmem:[#allocation3 + $0x30] sm:$0xff] %vm312_vm0, %v1256_v0  ;;  %320 = vst.msk [vmem:[#allocation3 + $0x38] sm:$0xff] %vm312_vm0, %v1256_v0 }
  0x11   : > { %321 = vst.msk [vmem:[#allocation3 + $0x40] sm:$0xff] %vm312_vm0, %v1256_v0  ;;  %322 = vst.msk [vmem:[#allocation3 + $0x48] sm:$0xff] %vm312_vm0, %v1256_v0 }
  0x12   : > { %323 = vst.msk [vmem:[#allocation3 + $0x50] sm:$0xff] %vm312_vm0, %v1256_v0  ;;  %324 = vst.msk [vmem:[#allocation3 + $0x58] sm:$0xff] %vm312_vm0, %v1256_v0 }
  0x13   : > { %325 = vst.msk [vmem:[#allocation3 + $0x60] sm:$0xff] %vm312_vm0, %v1256_v0  ;;  %326 = vst.msk [vmem:[#allocation3 + $0x68] sm:$0xff] %vm312_vm0, %v1256_v0 }
  0x14   : > { %327 = vst.msk [vmem:[#allocation3 + $0x70] sm:$0xff] %vm312_vm0, %v1256_v0  ;;  %328 = vst.msk [vmem:[#allocation3 + $0x78] sm:$0xff] %vm312_vm0, %v1256_v0 }
  0x15   : > { %329 = vst.msk [vmem:[#allocation4] sm:$0xff] %vm312_vm0, %v1257_v1  ;;  %330 = vst.msk [vmem:[#allocation4 + $0x8] sm:$0xff] %vm312_vm0, %v1257_v1 }
  0x16   : > { %331 = vst.msk [vmem:[#allocation4 + $0x10] sm:$0xff] %vm312_vm0, %v1257_v1  ;;  %332 = vst.msk [vmem:[#allocation4 + $0x18] sm:$0xff] %vm312_vm0, %v1257_v1 }
  0x17   : > { %333 = vst.msk [vmem:[#allocation4 + $0x20] sm:$0xff] %vm312_vm0, %v1257_v1  ;;  %334 = vst.msk [vmem:[#allocation4 + $0x28] sm:$0xff] %vm312_vm0, %v1257_v1 }
  0x18   : > { %335 = vst.msk [vmem:[#allocation4 + $0x30] sm:$0xff] %vm312_vm0, %v1257_v1  ;;  %336 = vst.msk [vmem:[#allocation4 + $0x38] sm:$0xff] %vm312_vm0, %v1257_v1 }
  0x19   : > { %337 = vst.msk [vmem:[#allocation4 + $0x40] sm:$0xff] %vm312_vm0, %v1257_v1  ;;  %338 = vst.msk [vmem:[#allocation4 + $0x48] sm:$0xff] %vm312_vm0, %v1257_v1 }
  0x1a   : > { %339 = vst.msk [vmem:[#allocation4 + $0x50] sm:$0xff] %vm312_vm0, %v1257_v1  ;;  %340 = vst.msk [vmem:[#allocation4 + $0x58] sm:$0xff] %vm312_vm0, %v1257_v1 }
  0x1b   : > { %341 = vst.msk [vmem:[#allocation4 + $0x60] sm:$0xff] %vm312_vm0, %v1257_v1  ;;  %342 = vst.msk [vmem:[#allocation4 + $0x68] sm:$0xff] %vm312_vm0, %v1257_v1 }
  0x1c   : > { %343 = vst.msk [vmem:[#allocation4 + $0x70] sm:$0xff] %vm312_vm0, %v1257_v1  ;;  %344 = vst.msk [vmem:[#allocation4 + $0x78] sm:$0xff] %vm312_vm0, %v1257_v1 }
  0x1d   : > { %345 = vst [vmem:[#allocation5] sm:$0xff] %v1257_v1  ;;  %346 = vst [vmem:[#allocation5 + $0x8] sm:$0xff] %v1257_v1 }
  0x1e   : > { %347 = vst [vmem:[#allocation5 + $0x10] sm:$0xff] %v1257_v1  ;;  %348 = vst [vmem:[#allocation5 + $0x18] sm:$0xff] %v1257_v1 }
  0x1f   : > { %349 = vst [vmem:[#allocation5 + $0x20] sm:$0xff] %v1257_v1  ;;  %350 = vst [vmem:[#allocation5 + $0x28] sm:$0xff] %v1257_v1 }
  0x20   : > { %351 = vst [vmem:[#allocation5 + $0x30] sm:$0xff] %v1257_v1  ;;  %352 = vst [vmem:[#allocation5 + $0x38] sm:$0xff] %v1257_v1 }
  0x21   : > { %353 = vst [vmem:[#allocation5 + $0x40] sm:$0xff] %v1257_v1  ;;  %354 = vst [vmem:[#allocation5 + $0x48] sm:$0xff] %v1257_v1 }
  0x22   : > { %355 = vst [vmem:[#allocation5 + $0x50] sm:$0xff] %v1257_v1  ;;  %356 = vst [vmem:[#allocation5 + $0x58] sm:$0xff] %v1257_v1 }
  0x23   : > { %357 = vst [vmem:[#allocation5 + $0x60] sm:$0xff] %v1257_v1  ;;  %358 = vst [vmem:[#allocation5 + $0x68] sm:$0xff] %v1257_v1 }
  0x24   : > { %359 = vst [vmem:[#allocation5 + $0x70] sm:$0xff] %v1257_v1  ;;  %360 = vst [vmem:[#allocation5 + $0x78] sm:$0xff] %v1257_v1 }
  0x25 LB: >> { %v1258_v4 = vmov 0.0   ;;  %vm1259_vm1 = vmmov 0   ;;  %s1051_s9 = smul.u32 12, %s1246_s8  ;;  %vm393_vm2 = vcmask 1043456   ;;  %v1015_v8 = vcombine.low %v361_v2, %v362_v3  ;;  %s1054_s13 = sshll.u32 %s1246_s8, 3  ;;  %s1246_s8 = sphi %s1397_s8, %s368_s8  }
  0x26   : >> { %1079 = vmatprep.subr.bf16.mxu0 %v1258_v4  ;;  %1083 = vmatprep.mubr.msk.bf16.mxu0 %vm1259_vm1, %v1258_v4  ;;  %vm389_vm3 = vcmask 195584   ;;  %s448_s14 = scalar_lea.vmem [#allocation2], %s1054_s13  ;;  %s368_s8 = sadd.s32 1, %s1246_s8  }
  0x27   : >> { %s371_s12 = scalar_lea.vmem %s1488_s2, %s1051_s9  ;;  %p365_p5 = scmp.ge.s32.totalorder %s368_s8, 8  }
  0x28   : >> { %v1177_v5 = vld [vmem:[%s371_s12 + $0x8] ss:$0 sps:$4 sm:$0xff]   ;;  %v1178_v7 = vld [vmem:[%s371_s12] sm:$0xff]   ;;  %s1413_s15 = smov (%p365_p5), 0  }
  0x29   : >> { %v395_v6 = vsel %vm393_vm2, %v1177_v5, 0  ;;  %v1408_v14 = vld [vmem:[%s1390_s29] sm:$0xf] (%p365_p5)  ;;  %v1411_v15 = vld [vmem:[%s1390_s29 + $0x4] sm:$0xf] (%p365_p5) }
  0x2a   : >> { %1080 = vmatpush3.bf16.msra.mxu0 %v395_v6 }
  0x2b   : >> { %1081 = vmatprep.subr.bf16.mxu0 %v1258_v4 }
  0x2e   : >> { %1082 = vmatpush3.bf16.msra.mxu0 %v1178_v7 }
  0x31   : >> { %1084 = vmatmul.mubr.msk.bf16.vlgmr.msra.gmra.mxu0 %vm389_vm3, %v1015_v8 }
  0xf1   : >> { %v431_v9 = vpop.f32.mrf.mxu0 }
  0xf3   : >> { %v1085_v10 = vpop.f32.mrf.mxu0 }
  0xf4   : > { %367 = sbr.rel (!%p365_p5) target bundleno = 37 (0x25), region = 112 }
  0xf5   : >> { %v434_v11 = vpop.f32.mrf.mxu0 }
  0xf6   : >> { %v1061_v12 = vpack.c.bf16 %v434_v11, %v431_v9 }
  0xf7   : >> { %v1086_v13 = vpop.f32.mrf.mxu0 }
  0xf8   : >> { %1062 = vst [vmem:[%s448_s14] sm:$0xff] %v1061_v12  }
  0xf9 LB: >> { %v1260_v16 = vmov 0   ;;  %s1055_s16 = smul.u32 24, %s1250_s15  ;;  %v1024_v23 = vcombine.low %v1408_v14, %v1411_v15  ;;  %v1261_v24 = vmov 0.0   ;;  %s1056_s23 = sshll.u32 %s1250_s15, 3  ;;  %vm1262_vm4 = vmmov 0   ;;  %s1250_s15 = sphi %s1413_s15, %s458_s15  }
  0xfa   : >> { %528 = vmatprep.mubr.bf16.mxu0 %v1260_v16  ;;  %1179 = vset.pattern.permute.xlu1 %v1260_v16  ;;  %s543_s24 = scalar_lea.vmem [#allocation2], %s1056_s23  ;;  %vm597_vm5 = vcmask 130048   ;;  %s1431_s25 = sshll.u32 %s1250_s15, 4 }
  0xfb   : >> { %1180 = vset.pattern.permute.xlu0 %v1260_v16  ;;  %s461_s22 = scalar_lea.vmem %s1489_s3, %s1055_s16  ;;  %1087 = vmatprep.subr.bf16.mxu1 %v1261_v24  ;;  %s594_s26 = scalar_lea.vmem [#allocation3], %s1431_s25 }
  0xfc   : >> { %v464_v17 = vld [vmem:[%s461_s22 + $0x10] sm:$0xff]  ;;  %v1183_v20 = vld [vmem:[%s461_s22 + $0x4] ss:$8 sps:$4 sm:$0xff]   ;;  %v1185_v22 = vld [vmem:[%s461_s22] ss:$8 sps:$4 sm:$0xff]   ;;  %1089 = vmatprep.mubr.msk.bf16.mxu1 %vm1262_vm4, %v1261_v24  ;;  %s628_s27 = scalar_lea.vmem [#allocation4], %s1431_s25 }
  0xfd   : >> { %v1028_v18 = vcombine.high %v464_v17, %v464_v17  ;;  %v1027_v19 = vcombine.low %v464_v17, %v464_v17  ;;  %v595_v38 = vld [vmem:[%s594_s26] sm:$0xff]  ;;  %v596_v41 = vld [vmem:[%s594_s26 + $0x8] sm:$0xff]  ;;  %s644_s28 = scalar_lea.vmem [#allocation5], %s1431_s25  ;;  %s458_s15 = sadd.s32 1, %s1250_s15  }
  0xfe   : >> { %v629_v61 = vld [vmem:[%s628_s27] sm:$0xff]  ;;  %v630_v0 = vld [vmem:[%s628_s27 + $0x8] sm:$0xff]  ;;  %p455_p6 = scmp.ge.s32.totalorder %s458_s15, 8  }
  0xff   : >> { %1029 = vmatprep.subr.msk.bf16.mxu0 %vm393_vm2, %v1028_v18  ;;  %v491_v21 = vsel %vm393_vm2, %v1027_v19, 0  ;;  %v1186_v31 = vld [vmem:[%s543_s24] sm:$0xff]   ;;  %v646_v9 = vld [vmem:[%s644_s28 + $0x8] sm:$0xff]  ;;  %713 = vst [vmem:[#allocation6] sm:$0xff] (%p455_p6), %v1257_v1  ;;  %714 = vst [vmem:[#allocation6 + $0x8] sm:$0xff] (%p455_p6), %v1257_v1  ;;  %s1448_s29 = smov (%p455_p6), 0  }
 0x100   : >> { %509 = vmatpush1.bf16.msra.mxu0 %v491_v21  ;;  %v645_v6 = vld [vmem:[%s644_s28] sm:$0xff] }
 0x101   : >> { %510 = vmatprep.subr.bf16.mxu0 %v1183_v20 }
 0x104   : >> { %511 = vmatpush1.bf16.msra.mxu0 %v1185_v22 }
 0x105   : >> { %1093 = vmatprep.subr.bf16.mxu0 %v1261_v24 }
 0x107   : >> { %1030 = vmatmul.mubr.msk.bf16.vlgmr.msra.gmra.mxu0 %vm389_vm3, %v1024_v23 }
 0x108   : >> { %1095 = vmatprep.mubr.msk.bf16.mxu0 %vm1262_vm4, %v1261_v24 }
 0x1c7   : >> { %v530_v25 = vpop.f32.mrf.mxu0 }
 0x1c9   : >> { %v532_v26 = vpop.f32.mrf.mxu0 }
 0x1cb   : >> { %v534_v27 = vpop.f32.mrf.mxu0 }
 0x1cc   : >> { %v539_v28 = vpack.c.bf16 %v534_v27, %v530_v25 }
 0x1cd   : >> { %v536_v29 = vpop.f32.mrf.mxu0 }
 0x1ce   : >> { %v540_v30 = vpack.c.bf16 %v536_v29, %v532_v26  ;;  %1088 = vmatpush3.bf16.xpose.msra.mxu1 %v539_v28 }
 0x1d0   : >> { %1094 = vmatpush3.bf16.msra.mxu0 %v540_v30 }
 0x1d5   : >> { %1090 = vmatmul.mubr.bf16.vlgmr.msra.gmra.mxu1 %v1186_v31 }
 0x295   : >> { %v586_v32 = vpop.f32.mrf.mxu1 }
 0x296   : >> { %v598_v33 = vsel %vm597_vm5, %v586_v32, -inf }
 0x297   : >> { %599 = vmax.xlane.f32.xlu0 %v598_v33  ;;  %v1091_v34 = vpop.f32.mrf.mxu1 }
 0x299   : >> { %v589_v35 = vpop.f32.mrf.mxu1 }
 0x29a   : >> { %v601_v36 = vsel %vm597_vm5, %v589_v35, -inf }
 0x29b   : >> { %602 = vmax.xlane.f32.xlu0 %v601_v36  ;;  %v1092_v37 = vpop.f32.mrf.mxu1 }
 0x320   : >> { %v600_v39 = vpop.xlane.xlu0 %599 }
 0x321   : >> { %v604_v40 = vmax.f32 %v595_v38, %v600_v39 }
 0x323   : >> { %v606_v42 = vsub.f32 %v595_v38, %v604_v40  ;;  %708 = vst.msk [vmem:[%s594_s26] sm:$0xff] %vm312_vm0, %v604_v40  ;;  %614 = vperm.xlu1 %1179, %v604_v40  }
 0x324   : >> { %v603_v43 = vpop.xlane.xlu0 %602 }
 0x325   : >> { %v605_v44 = vmax.f32 %v596_v41, %v603_v43  ;;  %v608_v58 = vmul.f32 1.442695, %v606_v42 }
 0x327   : >> { %v607_v45 = vsub.f32 %v596_v41, %v605_v44  ;;  %709 = vst.msk [vmem:[%s594_s26 + $0x8] sm:$0xff] %vm312_vm0, %v605_v44  ;;  %619 = vperm.xlu1 %1179, %v605_v44  }
 0x329   : >> { %v610_v55 = vmul.f32 1.442695, %v607_v45 }
 0x39e   : >> { %v615_v46 = vpop.permute.xlu1 %614 }
 0x39f   : >> { %v622_v47 = vsub.f32 %v586_v32, %v615_v46 }
 0x3a1   : >> { %v624_v48 = vmul.f32 1.442695, %v622_v47 }
 0x3a2   : >> { %v620_v49 = vpop.permute.xlu1 %619 }
 0x3a3   : >> { %1187 = vpow2.f32 %v624_v48  ;;  %v623_v50 = vsub.f32 %v589_v35, %v620_v49 }
 0x3a5   : >> { %v626_v51 = vmul.f32 1.442695, %v623_v50 }
 0x3a7   : >> { %1189 = vpow2.f32 %v626_v51 }
 0x3a8   : >> { %1191 = vpow2.f32 %v610_v55 }
 0x3a9   : >> { %1193 = vpow2.f32 %v608_v58 }
 0x3b0   : >> { %v1188_v52 = vpop.eup %1187 }
 0x3b1   : >> { %v633_v53 = vsel %vm597_vm5, %v1188_v52, 0.0 }
 0x3b2   : >> { %634 = vadd.xlane.f32.xlu0 %v633_v53 }
 0x3b4   : >> { %v1190_v54 = vpop.eup %1189 }
 0x3b5   : >> { %v636_v56 = vsel %vm597_vm5, %v1190_v54, 0.0  ;;  %v659_v57 = vpack.c.bf16 %v1190_v54, %v1188_v52  ;;  %v1192_v59 = vpop.eup %1191 }
 0x3b6   : >> { %637 = vadd.xlane.f32.xlu1 %v636_v56  ;;  %v1194_v60 = vpop.eup %1193  ;;  %v632_v3 = vmul.f32 %v1192_v59, %v630_v0 }
 0x3b7   : >> { %1096 = vmatmul.mubr.msk.bf16.vlgmr.msra.gmra.mxu0 %vm597_vm5, %v659_v57  ;;  %v631_v62 = vmul.f32 %v1194_v60, %v629_v61 }
 0x3c7   : >> { %654 = vperm.xlu1 %1179, %v1192_v59  }
 0x3c8   : >> { %649 = vperm.xlu0 %1180, %v1194_v60  }
 0x43b   : >> { %v635_v63 = vpop.xlane.xlu0 %634 }
 0x43c   : >> { %v639_v2 = vadd.f32 %v635_v63, %v631_v62 }
 0x43e   : >> { %642 = vst.msk [vmem:[%s628_s27] sm:$0xff] %vm312_vm0, %v639_v2 }
 0x43f   : >> { %v638_v4 = vpop.xlane.xlu1 %637 }
 0x440   : >> { %v640_v5 = vadd.f32 %v638_v4, %v632_v3 }
 0x442   : >> { %643 = vst.msk [vmem:[%s628_s27 + $0x8] sm:$0xff] %vm312_vm0, %v640_v5 }
 0x443   : >> { %v650_v7 = vpop.permute.xlu0 %649  ;;  %v655_v10 = vpop.permute.xlu1 %654 }
 0x444   : >> { %v657_v8 = vmul.f32 %v650_v7, %v645_v6  ;;  %v658_v16 = vmul.f32 %v655_v10, %v646_v9 }
 0x477   : >> { %v697_v11 = vpop.f32.mrf.mxu0 }
 0x478   : >> { %v704_v12 = vadd.f32 %v697_v11, %v657_v8 }
 0x479   : >> { %v1097_v13 = vpop.f32.mrf.mxu0 }
 0x47a   : >> { %706 = vst [vmem:[%s644_s28] sm:$0xff] %v704_v12  ;;  %457 = sbr.rel (!%p455_p6) target bundleno = 249 (0xf9), region = 123 }
 0x47b   : >> { %v700_v17 = vpop.f32.mrf.mxu0 }
 0x47c   : >> { %v705_v18 = vadd.f32 %v700_v17, %v658_v16 }
 0x47d   : >> { %v1098_v19 = vpop.f32.mrf.mxu0 }
 0x47e   : >> { %707 = vst [vmem:[%s644_s28 + $0x8] sm:$0xff] %v705_v18 }
 0x47f LB: >> { %v1263_v20 = vmov 0   ;;  %v1264_v21 = vmov 0.0   ;;  %s1036_s30 = sshll.u32 %s1254_s29, 4  ;;  %s1057_s6 = sshll.u32 %s1254_s29, 6  ;;  %vm1265_vm6 = vmmov 0   ;;  %v742_v38 = vld [vmem:[#allocation6] sm:$0xff]  ;;  %s1254_s29 = sphi %s1448_s29, %s720_s29  }
 0x480   : >> { %1195 = vset.pattern.permute.xlu0 %v1263_v20  ;;  %1099 = vmatprep.subr.bf16.mxu0 %v1264_v21  ;;  %s1458_s10 = scalar_lea.vmem %s1490_s4, %s1057_s6  ;;  %s725_s11 = scalar_lea.vmem [#allocation4], %s1036_s30  ;;  %v743_v42 = vld [vmem:[#allocation6 + $0x8] sm:$0xff] }
 0x481   : >> { %v726_v1 = vld [vmem:[%s725_s11] sm:$0xff]  ;;  %v727_v14 = vld [vmem:[%s725_s11 + $0x8] sm:$0xff]  ;;  %v1196_v15 = vld [vmem:[%s1458_s10 + $0x38] sm:$0xff]   ;;  %1115 = vmatprep.mubr.msk.bf16.mxu0 %vm1265_vm6, %v1264_v21  ;;  %s722_s12 = scalar_lea.vmem [#allocation5], %s1036_s30  ;;  %s720_s29 = sadd.s32 1, %s1254_s29  }
 0x482   : >> { %1204 = vrcp.f32 %v726_v1  ;;  %1100 = vmatpush3.bf16.msra.mxu0 %v1196_v15  ;;  %v1197_v22 = vld [vmem:[%s1458_s10 + $0x30] sm:$0xff]   ;;  %v1198_v23 = vld [vmem:[%s1458_s10 + $0x28] sm:$0xff]   ;;  %v1199_v24 = vld [vmem:[%s1458_s10 + $0x20] sm:$0xff]   ;;  %p717_p7 = scmp.ge.s32.totalorder %s720_s29, 8  }
 0x483   : >> { %1206 = vrcp.f32 %v727_v14  ;;  %1101 = vmatprep.subr.bf16.mxu0 %v1264_v21  ;;  %v1200_v26 = vld [vmem:[%s1458_s10 + $0x18] sm:$0xff]   ;;  %v1201_v28 = vld [vmem:[%s1458_s10 + $0x10] sm:$0xff]   ;;  %v1202_v29 = vld [vmem:[%s1458_s10 + $0x8] sm:$0xff]  }
 0x484   : >> { %v1203_v30 = vld [vmem:[%s1458_s10] sm:$0xff]  }
 0x485   : >> { %v723_v32 = vld [vmem:[%s722_s12] sm:$0xff]  ;;  %v724_v33 = vld [vmem:[%s722_s12 + $0x8] sm:$0xff] }
 0x486   : >> { %1102 = vmatpush3.bf16.msra.mxu0 %v1197_v22 }
 0x487   : >> { %1103 = vmatprep.subr.bf16.mxu0 %v1264_v21 }
 0x48a   : >> { %1104 = vmatpush3.bf16.msra.mxu0 %v1198_v23 }
 0x48b   : >> { %1105 = vmatprep.subr.bf16.mxu0 %v1264_v21 }
 0x48e   : >> { %1106 = vmatpush3.bf16.msra.mxu0 %v1199_v24 }
 0x48f   : >> { %v1205_v25 = vpop.eup %1204  ;;  %1107 = vmatprep.subr.bf16.mxu0 %v1264_v21 }
 0x490   : >> { %732 = vperm.xlu0 %1195, %v1205_v25   ;;  %v1207_v27 = vpop.eup %1206 }
 0x492   : >> { %1108 = vmatpush3.bf16.msra.mxu0 %v1200_v26 }
 0x493   : >> { %1109 = vmatprep.subr.bf16.mxu0 %v1264_v21 }
 0x494   : >> { %737 = vperm.xlu0 %1195, %v1207_v27  }
 0x496   : >> { %1110 = vmatpush3.bf16.msra.mxu0 %v1201_v28 }
 0x497   : >> { %1111 = vmatprep.subr.bf16.mxu0 %v1264_v21 }
 0x49a   : >> { %1112 = vmatpush3.bf16.msra.mxu0 %v1202_v29 }
 0x49b   : >> { %1113 = vmatprep.subr.bf16.mxu0 %v1264_v21 }
 0x49e   : >> { %1114 = vmatpush3.bf16.msra.mxu0 %v1203_v30 }
 0x50b   : >> { %v733_v31 = vpop.permute.xlu0 %732 }
 0x50c   : >> { %v740_v35 = vmul.f32 %v733_v31, %v723_v32 }
 0x50f   : >> { %v738_v34 = vpop.permute.xlu0 %737 }
 0x510   : >> { %v741_v36 = vmul.f32 %v738_v34, %v724_v33 }
 0x512   : >> { %v744_v37 = vpack.c.bf16 %v741_v36, %v740_v35 }
 0x514   : >> { %1116 = vmatmul.mubr.bf16.vlgmr.msra.gmra.mxu0 %v744_v37 }
 0x5d4   : >> { %v845_v39 = vpop.f32.mrf.mxu0 }
 0x5d5   : >> { %v852_v40 = vadd.f32 %v845_v39, %v742_v38 }
 0x5d6   : >> { %v1117_v41 = vpop.f32.mrf.mxu0 }
 0x5d7   : >> { %854 = vst [vmem:[#allocation6] sm:$0xff] %v852_v40 }
 0x5d8   : >> { %v848_v43 = vpop.f32.mrf.mxu0 }
 0x5d9   : >> { %v853_v44 = vadd.f32 %v848_v43, %v743_v42 }
 0x5da   : >> { %v1118_v45 = vpop.f32.mrf.mxu0 }
 0x5db   : >> { %855 = vst [vmem:[#allocation6 + $0x8] sm:$0xff] %v853_v44 }
 0x5dc   : > { %719 = sbr.rel (!%p717_p7) target bundleno = 1151 (0x47f), region = 134 }
 0x5de   : > { %v856_v46 = vld [vmem:[#allocation6] sm:$0xff] (%p717_p7) }
 0x5df   : > { %858 = vst [vmem:[%s1395_s7] sm:$0xff] (%p717_p7), %v856_v46 }
 0x5e2   : > { %v857_v47 = vld [vmem:[#allocation6 + $0x8] sm:$0xff] }
 0x5e3   : > { %859 = vst [vmem:[%s1395_s7 + $0x8] sm:$0xff] %v857_v47 }
 0x5e4 PF: > { %s15_s20 = sadd.s32 1, %s1242_s20   ;;  %s1492_s18 = smov %s1238_s19 }
 0x5e5   : > { %p12_p8 = scmp.ge.s32.totalorder %s15_s20, 4   ;;  %s1493_s19 = smov %s1495_s21 }
 0x5e7   :  { %14 = sbr.rel (!%p12_p8) target bundleno = 2 (0x2), region = 145 }

</bundles_post_ra>
